<compile_context>
chip_gen: v7x
topology: tpu7x:2x2x1
jax: 0.10.0
libtpu: 0.0.40
codegen_flags: <defaults>
</compile_context>

<pallas_src>
import functools

import jax
import jax.numpy as jnp
import numpy as np
from jax import lax
from jax.experimental import pallas as pl
from jax.experimental.pallas import tpu as pltpu

KSIZE = 4
STRIDE = 2
PAD = 1
BN_EPS = 1e-5

_VMEM_LIMIT = 32 * 1024 * 1024      # scoped-VMEM limit handed to Mosaic
_VMEM_BUDGET = 20 * 1024 * 1024     # self-imposed double-buffered tile budget (v7x-safe)
_DEFAULT_BLOCK_M = 8192             # lane tile along M; review: 4096-8192 amortizes step overhead


def _round_up(x, m):
    return ((x + m - 1) // m) * m


def _convt_stats_kernel(p_ref, w_ref, y_ref, sum_ref, ssq_ref, sum_sc, ssq_sc):
    """Fused-parity transposed-conv matmul + per-channel sum/sumsq accumulation.

    p_ref:   (K, tm)  bf16  3x3-tap patches^T tile (M on the lane axis)
    w_ref:   (C, K)   bf16  fused parity weight (C = 4*Cout), resident across the grid
    y_ref:   (C, tm)  bf16  un-normalized conv output tile (bf16 intermediate store)
    sum_ref: (C, 1)   f32   per-(parity, channel) sum, per-core output (written once)
    ssq_ref: (C, 1)   f32   per-(parity, channel) sum of squares, per-core output
    sum_sc/ssq_sc: (C, 1) f32 VMEM scratch accumulators
    """
    i = pl.program_id(1)

    y = jnp.dot(w_ref[...], p_ref[...], preferred_element_type=jnp.float32)
    y_ref[...] = y.astype(y_ref.dtype)          # bf16 store: halves the dominant HBM write

    @pl.when(i == 0)
    def _init():
        sum_sc[...] = jnp.zeros_like(sum_sc)
        ssq_sc[...] = jnp.zeros_like(ssq_sc)

    # Stats come from the f32 MXU result, *before* the bf16 cast.
    sum_sc[...] += jnp.sum(y, axis=1, keepdims=True)
    ssq_sc[...] += jnp.sum(y * y, axis=1, keepdims=True)

    @pl.when(i == pl.num_programs(1) - 1)
    def _flush():
        sum_ref[...] = sum_sc[...]
        ssq_ref[...] = ssq_sc[...]


def _build_patches_t(x):
    """3x3-tap patches of the 1-padded input, transposed to (Cin*9, M), bf16.

    Row order: (ci, dh+1, dw+1); column order: (n, r, s) with M = N*H*W.
    """
    n, cin, h, w = x.shape
    m = n * h * w
    x_c = jnp.transpose(x, (1, 0, 2, 3))                       # (Cin, N, H, W)
    x_cp = jnp.pad(x_c, ((0, 0), (0, 0), (1, 1), (1, 1)))      # (Cin, N, H+2, W+2)
    slabs = [x_cp[:, :, a:a + h, b:b + w] for a in range(3) for b in range(3)]
    p_t = jnp.stack(slabs, axis=1).reshape(cin * 9, m)         # (Cin*9, M)
    return p_t.astype(jnp.bfloat16), m


def _build_weight_t(weight):
    """Fused-parity weight matrix (4*Cout, Cin*9), bf16.

    Sub-pixel decomposition of ConvTranspose2d(k=4, s=2, p=1): output pixel (2r+ph, 2s+pw)
    only sees input taps (r+dh, s+dw) with kernel index k = p + 1 - 2*d (valid when 0<=k<4).
    """
    cin, cout = weight.shape[0], weight.shape[1]
    w4 = jnp.zeros((2, 2, cout, cin, 3, 3), jnp.float32)
    for ph in range(2):
        for dh in (-1, 0, 1):
            kh = ph + 1 - 2 * dh
            if not 0 <= kh < KSIZE:
                continue
            for pw in range(2):
                for dw in (-1, 0, 1):
                    kw = pw + 1 - 2 * dw
                    if not 0 <= kw < KSIZE:
                        continue
                    w4 = w4.at[ph, pw, :, :, dh + 1, dw + 1].set(weight[:, :, kh, kw].T)
    return w4.reshape(4 * cout, cin * 9).astype(jnp.bfloat16)


def _pick_block_m(m_total, requested, k, c):
    """Lane tile along M: multiple of 128, scaled to the problem, within the VMEM budget."""
    bm = _DEFAULT_BLOCK_M if requested is None else int(requested)
    bm = _round_up(max(128, min(bm, _round_up(m_total, 128))), 128)
    # Double-buffered bf16 patch-in + bf16 y-out per M column (weights/stats are negligible).
    bytes_per_col = 2 * (k * 2 + c * 2)
    max_bm = max(128, (_VMEM_BUDGET // bytes_per_col) // 128 * 128)
    return min(bm, max_bm)


@functools.partial(jax.jit, static_argnames=("block_m",))
def decoder_block(x, weight, bias, gamma, beta, *, block_m=None):
    """Forward pass of DecoderBlock (train-mode BatchNorm, batch statistics).

    x:      (N, Cin, H, W)      NCHW float32
    weight: (Cin, Cout, 4, 4)   PyTorch ConvTranspose2d layout
    bias:   (Cout,)             accepted for API parity; mathematically cancelled by train-BN
    gamma, beta: (Cout,)        BatchNorm affine parameters
    returns (N, Cout, 2H, 2W)   NCHW float32
    """
    del bias  # per-channel constant is exactly removed by train-mode BN mean subtraction
    n, cin, h, w = x.shape
    cout = weight.shape[1]
    c = 4 * cout            # fused parity channels (ph, pw, co), co minor
    k = cin * 9             # 3x3 taps per input channel

    m_total = n * h * w
    bm = _pick_block_m(m_total, block_m, k, c)

    num_tiles = -(-m_total // bm)
    n_split = 2 if num_tiles >= 2 else 1        # feeds both v7x TensorCores; no-op on v5e/v6e
    tiles_per_split = -(-num_tiles // n_split)
    m_pad = n_split * tiles_per_split * bm

    p_t, m = _build_patches_t(x)                                # (K, M) bf16
    if m_pad != m:
        p_t = jnp.pad(p_t, ((0, 0), (0, m_pad - m)))            # zero cols -> y=0 -> stats unaffected
    w_t = _build_weight_t(weight)                               # (C, K) bf16

    grid = (n_split, tiles_per_split)

    # ---- Pass 1 (Pallas): matmul + per-channel sum / sumsq, bf16 y intermediate -------------
    y_lin, ch_sum, ch_ssq = pl.pallas_call(
        _convt_stats_kernel,
        grid=grid,
        in_specs=[
            pl.BlockSpec((k, bm), lambda s, i: (0, s * tiles_per_split + i)),   # patches^T tile
            pl.BlockSpec((c, k), lambda s, i: (0, 0)),                          # weight, resident
        ],
        out_specs=(
            pl.BlockSpec((c, bm), lambda s, i: (0, s * tiles_per_split + i)),   # bf16 y tile
            pl.BlockSpec((None, c, 1), lambda s, i: (s, 0, 0)),                 # per-core sums
            pl.BlockSpec((None, c, 1), lambda s, i: (s, 0, 0)),                 # per-core sumsq
        ),
        out_shape=(
            jax.ShapeDtypeStruct((c, m_pad), jnp.bfloat16),
            jax.ShapeDtypeStruct((n_split, c, 1), jnp.float32),
            jax.ShapeDtypeStruct((n_split, c, 1), jnp.float32),
        ),
        scratch_shapes=[
            pltpu.VMEM((c, 1), jnp.float32),
            pltpu.VMEM((c, 1), jnp.float32),
        ],
        compiler_params=pltpu.CompilerParams(
            dimension_semantics=("parallel", "arbitrary"),   # core split x accumulator-carried M
            vmem_limit_bytes=_VMEM_LIMIT,
        ),
    )(p_t, w_t)

    # ---- Tiny per-channel reduction + folded BN affine (XLA, O(Cout) work) -------------------
    inv_cnt = 1.0 / float(4 * m)                                # BN reduces over N*(2H)*(2W)
    s_c = ch_sum.sum(axis=(0, 2)).reshape(4, cout).sum(axis=0)
    ss_c = ch_ssq.sum(axis=(0, 2)).reshape(4, cout).sum(axis=0)
    mean = s_c * inv_cnt
    var = jnp.maximum(ss_c * inv_cnt - mean * mean, 0.0)        # biased (train-mode) variance
    scale = gamma.astype(jnp.float32) * lax.rsqrt(var + BN_EPS)
    shift = beta.astype(jnp.float32) - mean * scale
    scale_c = jnp.tile(scale, 4)[:, None]                       # (4*Cout, 1), co minor
    shift_c = jnp.tile(shift, 4)[:, None]

    # ---- BN affine + ReLU fused by XLA into the (unavoidable) NCHW relayout copy -------------
    y = y_lin[:, :m].astype(jnp.float32)
    out_flat = jnp.maximum(y * scale_c + shift_c, 0.0)
    out6 = out_flat.reshape(2, 2, cout, n, h, w)                # (ph, pw, co, n, r, s)
    return out6.transpose(3, 2, 4, 0, 5, 1).reshape(n, cout, STRIDE * h, STRIDE * w)


def _reference(x, weight, bias, gamma, beta):
    """Pure-JAX reference (independent path via lax.conv_general_dilated).

    Inputs are rounded to bf16 (then all math in f32) so the comparison against the
    bf16-operand / f32-accumulate MXU matmul is apples-to-apples. Includes the conv bias,
    demonstrating that train-mode BN cancels it exactly.
    """
    xb = x.astype(jnp.bfloat16).astype(jnp.float32)
    wb = weight.astype(jnp.bfloat16).astype(jnp.float32)
    w_conv = jnp.transpose(wb[:, :, ::-1, ::-1], (1, 0, 2, 3))  # (Cout, Cin, 4, 4)
    y = lax.conv_general_dilated(
        xb, w_conv, window_strides=(1, 1), padding=((2, 2), (2, 2)),
        lhs_dilation=(2, 2), dimension_numbers=("NCHW", "OIHW", "NCHW"))
    y = y + bias[None, :, None, None]
    mean = y.mean(axis=(0, 2, 3), keepdims=True)
    var = y.var(axis=(0, 2, 3), keepdims=True)                  # biased, train-mode BN
    y = (y - mean) / jnp.sqrt(var + BN_EPS)
    y = y * gamma[None, :, None, None] + beta[None, :, None, None]
    return jnp.maximum(y, 0.0)


if __name__ == "__main__":
    # Small shapes consistent with the module: in_channels=4, out_channels=8.
    N, CIN, COUT, H, W = 2, 4, 8, 16, 16

    key = jax.random.PRNGKey(0)
    kx, kw, kb, kg, kbe = jax.random.split(key, 5)
    x = jax.random.normal(kx, (N, CIN, H, W), jnp.float32)
    weight = jax.random.normal(kw, (CIN, COUT, KSIZE, KSIZE), jnp.float32) * 0.1
    bias = jax.random.normal(kb, (COUT,), jnp.float32) * 0.1
    gamma = 1.0 + 0.1 * jax.random.normal(kg, (COUT,), jnp.float32)
    beta = 0.1 * jax.random.normal(kbe, (COUT,), jnp.float32)

    ref = jax.block_until_ready(_reference(x, weight, bias, gamma, beta))

    # block_m=128 -> 4 M-tiles split 2-way on the "parallel" axis: exercises the tiled
    # accumulation, scratch flush, and (on v7x) dual-TensorCore path.
    out_tiled = jax.block_until_ready(
        decoder_block(x, weight, bias, gamma, beta, block_m=128))
    assert out_tiled.shape == (N, COUT, STRIDE * H, STRIDE * W)
    np.testing.assert_allclose(np.asarray(out_tiled), np.asarray(ref), rtol=2e-2, atol=2e-2)

    # Auto block_m (clamped to the problem size): single-tile / single-split path.
    out_auto = jax.block_until_ready(decoder_block(x, weight, bias, gamma, beta))
    np.testing.assert_allclose(np.asarray(out_auto), np.asarray(ref), rtol=2e-2, atol=2e-2)

    print("KERNEL_OK")
</pallas_src>

<mosaic_0001>
module attributes {stable_mosaic.version = 11 : i64} {
  func.func @_convt_stats_kernel(%arg0: i32, %arg1: i32, %arg2: memref<36x128xbf16, #tpu.memory_space<vmem>>, %arg3: memref<32x36xbf16, #tpu.memory_space<vmem>>, %arg4: memref<32x128xbf16, #tpu.memory_space<vmem>>, %arg5: memref<1x32x1xf32, #tpu.memory_space<vmem>>, %arg6: memref<1x32x1xf32, #tpu.memory_space<vmem>>, %arg7: memref<32x1xf32, #tpu.memory_space<vmem>>, %arg8: memref<32x1xf32, #tpu.memory_space<vmem>>) attributes {dimension_semantics = [#tpu.dimension_semantics<parallel>, #tpu.dimension_semantics<arbitrary>], iteration_bounds = array<i64: 2, 2>, scalar_prefetch = 0 : i64, scratch_operands = 2 : i64, tpu.core_type = #tpu.core_type<tc>, window_params = [{transform_indices = @transform_0, window_bounds = array<i64: 36, 128>}, {pipeline_mode = #tpu.pipeline_mode<synchronous>, transform_indices = @transform_1, window_bounds = array<i64: 32, 36>}, {transform_indices = @transform_2, window_bounds = array<i64: 32, 128>}, {transform_indices = @transform_3, window_bounds = array<i64: 1, 32, 1>}, {transform_indices = @transform_4, window_bounds = array<i64: 1, 32, 1>}]} {
    %c0 = arith.constant 0 : index
    %c0_0 = arith.constant 0 : index
    %0 = vector.load %arg3[%c0, %c0_0] : memref<32x36xbf16, #tpu.memory_space<vmem>>, vector<32x36xbf16>
    %c0_1 = arith.constant 0 : index
    %c0_2 = arith.constant 0 : index
    %1 = vector.load %arg2[%c0_1, %c0_2] : memref<36x128xbf16, #tpu.memory_space<vmem>>, vector<36x128xbf16>
    %cst = arith.constant dense<0.000000e+00> : vector<32x128xf32>
    %2 = tpu.matmul %0, %1, %cst {dimension_numbers = #tpu.dot_dimension_numbers<[1], [0], [0], [1], [0, 0, 1, 1], [], []>} : vector<32x36xbf16>, vector<36x128xbf16>, vector<32x128xf32> -> vector<32x128xf32>
    %3 = arith.truncf %2 : vector<32x128xf32> to vector<32x128xbf16>
    %c0_3 = arith.constant 0 : index
    %c0_4 = arith.constant 0 : index
    %4 = vector.load %arg4[%c0_3, %c0_4] : memref<32x128xbf16, #tpu.memory_space<vmem>>, vector<32x128xbf16>
    tpu.vector_store %arg4[%c0_3, %c0_4], %3 {strides = array<i32>} : memref<32x128xbf16, #tpu.memory_space<vmem>>, vector<32x128xbf16>,
    %c0_i32 = arith.constant 0 : i32
    %5 = arith.cmpi eq, %arg1, %c0_i32 : i32
    %6 = arith.extui %5 : i1 to i32
    %c0_i32_5 = arith.constant 0 : i32
    %7 = arith.cmpi ne, %6, %c0_i32_5 : i32
    scf.if %7 {
      %cst_17 = arith.constant 0.000000e+00 : f32
      %22 = vector.broadcast %cst_17 : f32 to vector<32x1xf32>
      %c0_18 = arith.constant 0 : index
      %c0_19 = arith.constant 0 : index
      %23 = vector.load %arg7[%c0_18, %c0_19] : memref<32x1xf32, #tpu.memory_space<vmem>>, vector<32x1xf32>
      tpu.vector_store %arg7[%c0_18, %c0_19], %22 {strides = array<i32>} : memref<32x1xf32, #tpu.memory_space<vmem>>, vector<32x1xf32>,
      %cst_20 = arith.constant 0.000000e+00 : f32
      %24 = vector.broadcast %cst_20 : f32 to vector<32x1xf32>
      %c0_21 = arith.constant 0 : index
      %c0_22 = arith.constant 0 : index
      %25 = vector.load %arg8[%c0_21, %c0_22] : memref<32x1xf32, #tpu.memory_space<vmem>>, vector<32x1xf32>
      tpu.vector_store %arg8[%c0_21, %c0_22], %24 {strides = array<i32>} : memref<32x1xf32, #tpu.memory_space<vmem>>, vector<32x1xf32>,
    } else {
    }
    %c0_6 = arith.constant 0 : index
    %c0_7 = arith.constant 0 : index
    %8 = vector.load %arg7[%c0_6, %c0_7] : memref<32x1xf32, #tpu.memory_space<vmem>>, vector<32x1xf32>
    %cst_8 = arith.constant dense<0.000000e+00> : vector<32xf32>
    %9 = vector.multi_reduction <add>, %2, %cst_8 [1] : vector<32x128xf32> to vector<32xf32>
    %10 = vector.shape_cast %9 : vector<32xf32> to vector<32x1xf32>
    %11 = arith.addf %8, %10 : vector<32x1xf32>
    %c0_9 = arith.constant 0 : index
    %c0_10 = arith.constant 0 : index
    %12 = vector.load %arg7[%c0_9, %c0_10] : memref<32x1xf32, #tpu.memory_space<vmem>>, vector<32x1xf32>
    tpu.vector_store %arg7[%c0_9, %c0_10], %11 {strides = array<i32>} : memref<32x1xf32, #tpu.memory_space<vmem>>, vector<32x1xf32>,
    %c0_11 = arith.constant 0 : index
    %c0_12 = arith.constant 0 : index
    %13 = vector.load %arg8[%c0_11, %c0_12] : memref<32x1xf32, #tpu.memory_space<vmem>>, vector<32x1xf32>
    %14 = arith.mulf %2, %2 : vector<32x128xf32>
    %cst_13 = arith.constant dense<0.000000e+00> : vector<32xf32>
    %15 = vector.multi_reduction <add>, %14, %cst_13 [1] : vector<32x128xf32> to vector<32xf32>
    %16 = vector.shape_cast %15 : vector<32xf32> to vector<32x1xf32>
    %17 = arith.addf %13, %16 : vector<32x1xf32>
    %c0_14 = arith.constant 0 : index
    %c0_15 = arith.constant 0 : index
    %18 = vector.load %arg8[%c0_14, %c0_15] : memref<32x1xf32, #tpu.memory_space<vmem>>, vector<32x1xf32>
    tpu.vector_store %arg8[%c0_14, %c0_15], %17 {strides = array<i32>} : memref<32x1xf32, #tpu.memory_space<vmem>>, vector<32x1xf32>,
    %c1_i32 = arith.constant 1 : i32
    %19 = arith.cmpi eq, %arg1, %c1_i32 : i32
    %20 = arith.extui %19 : i1 to i32
    %c0_i32_16 = arith.constant 0 : i32
    %21 = arith.cmpi ne, %20, %c0_i32_16 : i32
    scf.if %21 {
      %c0_17 = arith.constant 0 : index
      %c0_18 = arith.constant 0 : index
      %22 = vector.load %arg7[%c0_17, %c0_18] : memref<32x1xf32, #tpu.memory_space<vmem>>, vector<32x1xf32>
      %c0_19 = arith.constant 0 : index
      %c0_20 = arith.constant 0 : index
      %c0_21 = arith.constant 0 : index
      %23 = vector.load %arg5[%c0_19, %c0_20, %c0_21] : memref<1x32x1xf32, #tpu.memory_space<vmem>>, vector<1x32x1xf32>
      %24 = vector.shape_cast %23 : vector<1x32x1xf32> to vector<32x1xf32>
      %25 = vector.shape_cast %22 : vector<32x1xf32> to vector<1x32x1xf32>
      tpu.vector_store %arg5[%c0_19, %c0_20, %c0_21], %25 {strides = array<i32>} : memref<1x32x1xf32, #tpu.memory_space<vmem>>, vector<1x32x1xf32>,
      %c0_22 = arith.constant 0 : index
      %c0_23 = arith.constant 0 : index
      %26 = vector.load %arg8[%c0_22, %c0_23] : memref<32x1xf32, #tpu.memory_space<vmem>>, vector<32x1xf32>
      %c0_24 = arith.constant 0 : index
      %c0_25 = arith.constant 0 : index
      %c0_26 = arith.constant 0 : index
      %27 = vector.load %arg6[%c0_24, %c0_25, %c0_26] : memref<1x32x1xf32, #tpu.memory_space<vmem>>, vector<1x32x1xf32>
      %28 = vector.shape_cast %27 : vector<1x32x1xf32> to vector<32x1xf32>
      %29 = vector.shape_cast %26 : vector<32x1xf32> to vector<1x32x1xf32>
      tpu.vector_store %arg6[%c0_24, %c0_25, %c0_26], %29 {strides = array<i32>} : memref<1x32x1xf32, #tpu.memory_space<vmem>>, vector<1x32x1xf32>,
    } else {
    }
    return
  }
  func.func @transform_0(%arg0: i32, %arg1: i32) -> (i32, i32) {
    %c2_i32 = arith.constant 2 : i32
    %0 = arith.muli %arg0, %c2_i32 : i32
    %1 = arith.addi %0, %arg1 : i32
    %c0_i32 = arith.constant 0 : i32
    %c0_i32_0 = arith.constant 0 : i32
    return %c0_i32, %1 : i32, i32
  }
  func.func @transform_1(%arg0: i32, %arg1: i32) -> (i32, i32) {
    %c0_i32 = arith.constant 0 : i32
    %c0_i32_0 = arith.constant 0 : i32
    %c0_i32_1 = arith.constant 0 : i32
    return %c0_i32, %c0_i32_0 : i32, i32
  }
  func.func @transform_2(%arg0: i32, %arg1: i32) -> (i32, i32) {
    %c2_i32 = arith.constant 2 : i32
    %0 = arith.muli %arg0, %c2_i32 : i32
    %1 = arith.addi %0, %arg1 : i32
    %c0_i32 = arith.constant 0 : i32
    %c0_i32_0 = arith.constant 0 : i32
    return %c0_i32, %1 : i32, i32
  }
  func.func @transform_3(%arg0: i32, %arg1: i32) -> (i32, i32, i32) {
    %c0_i32 = arith.constant 0 : i32
    %c0_i32_0 = arith.constant 0 : i32
    %c0_i32_1 = arith.constant 0 : i32
    return %arg0, %c0_i32, %c0_i32_0 : i32, i32, i32
  }
  func.func @transform_4(%arg0: i32, %arg1: i32) -> (i32, i32, i32) {
    %c0_i32 = arith.constant 0 : i32
    %c0_i32_0 = arith.constant 0 : i32
    %c0_i32_1 = arith.constant 0 : i32
    return %arg0, %c0_i32, %c0_i32_0 : i32, i32, i32
  }
}

</mosaic_0001>

<bundles_post_ra>
// kernel: tile.18
= control target key start
LH: loop header
LB: loop body
LE: loop exit
PB: predicated region body
PF: predicated region fallthrough
CT: control target
= control target key end

     0   :  { %s22_s0 = inlined_call_operand.vmem [shape: f32[8], index: 0, kind: input, shape index: {}]   ;;  %s23_s1 = inlined_call_operand.vmem [shape: f32[4,8], index: 1, kind: output, shape index: {}]  }
   0x1   :  { %v4_v0 = vld [vmem:[%s22_s0] ss:$0 sm:$0xff] }
   0x2   :  { %5 = vst [vmem:[%s23_s1] sm:$0xf] %v4_v0 }

// kernel: decoder_block.1
= control target key start
LH: loop header
LB: loop body
LE: loop exit
PB: predicated region body
PF: predicated region fallthrough
CT: control target
= control target key end

     0   :  { %s906_s15 = smov 0   ;;  %s908_s16 = smov 0   ;;  %s1054_s0 = inlined_call_operand.vmem [shape: bf16[36,512], index: 0, kind: input, shape index: {}]   ;;  %s1055_s1 = inlined_call_operand.vmem [shape: bf16[32,36], index: 1, kind: input, shape index: {}]   ;;  %s1056_s2 = inlined_call_operand.vmem [shape: bf16[32,512], index: 2, kind: output, shape index: {0}]   ;;  %s1057_s3 = inlined_call_operand.vmem [shape: f32[2,32,1], index: 3, kind: output, shape index: {1}]   ;;  %s1058_s4 = inlined_call_operand.vmem [shape: f32[2,32,1], index: 4, kind: output, shape index: {2}]  }
   0x1   :  { %s910_s17 = smov 0   ;;  %s912_s18 = smov 0  }
   0x2   :  { %s914_s19 = smov 0   ;;  %s916_s20 = smov 0  }
   0x3   :  { %s918_s21 = smov 0  }
   0x4 LB: > { %s24_s22 = sadd.s32 1, %s870_s19  ;;  %s27_s23 = sadd.s32 1, %s874_s20  ;;  %s878_s21 = sphi %s918_s21, %s15_s21   ;;  %s874_s20 = sphi %s916_s20, %s1065_s20   ;;  %s870_s19 = sphi %s914_s19, %s1064_s19   ;;  %s866_s18 = sphi %s912_s18, %s1063_s18   ;;  %s862_s17 = sphi %s910_s17, %s1062_s17   ;;  %s858_s16 = sphi %s908_s16, %s1061_s16   ;;  %s854_s15 = sphi %s906_s15, %s1060_s15  }
   0x5   : > { %p25_p0 = scmp.ge.s32.totalorder %s24_s22, 2  ;;  %s693_s24 = sadd.s32 4294967295, %s878_s21  }
   0x6   : > { %s695_s25 = sshll.u32 %s874_s20, 1  ;;  %p45_p1 = scmp.ne.s32.totalorder %s858_s16, %s854_s15 }
   0x7   : > { %s1067_s22 = smov (%p25_p0, %s24_s22), 0  ;;  %s1069_s23 = smov (!%p25_p0, %s27_s23), %s874_s20 }
   0x8   : > { %p29_p2 = scmp.ge.s32.totalorder %s1069_s23, 2  ;;  %p46_p3 = scmp.eq.s32.totalorder %s878_s21, 0 }
   0x9   : > { %s32_s26 = sadd.s32 %s870_s19, %s695_s25  ;;  %p100_p4 = scmp.eq.s32.totalorder %s693_s24, 3 }
   0xa   : > { %s1071_s23 = smov (%p29_p2, %s1069_s23), 0  ;;  %p47_p5 = por %p46_p3, %p45_p1 }
   0xb   : > { %p954_p6 = por %p100_p4, %p45_p1  ;;  %s696_s28 = sshll.u32 %s1071_s23, 1 }
   0xc   : > { %s34_s29 = sadd.s32 %s696_s28, %s1067_s22  ;;  %s38_s5 = sadd.s32 1, %s858_s16 }
   0xd   : > { %s35_s30 = ssub.s32 %s32_s26, %s34_s29  ;;  %p700_p8 = scmp.ge.s32.totalorder %s878_s21, 4 }
   0xe   : > { %p36_p7 = scmp.eq.s32.totalorder %s35_s30, 0 }
   0xf   : > { %177 = sbr.rel (%p700_p8) target bundleno = 29 (0x1d), region = 20 }
  0x10   : > { %s962_s6 = scalar_select %p36_p7, %s858_s16, %s38_s5  }
  0x16   : > { %180 = sbr.rel (!%p47_p5) target bundleno = 29 (0x1d), region = 24  ;;  %s182_s7 = sand.u32 (%p47_p5), 1, %s858_s16  }
  0x17   : > { %s702_s8 = sshll.u32 (%p47_p5), %s32_s26, 2  ;;  %s760_s9 = smul.u32 (%p47_p5), 20, %s182_s7 }
  0x18   : > { %s188_s12 = scalar_lea.vmem (%p47_p5), %s1054_s0, %s702_s8 }
  0x19   : > { %v204_v0 = vld [vmem:[%s188_s12] sm:$0xf] (%p47_p5)  ;;  %v206_v1 = vld [vmem:[%s188_s12 + $0x10] sm:$0xf] (%p47_p5)  ;;  %s184_s13 = scalar_lea.vmem (%p47_p5), [#allocation4], %s760_s9 }
  0x1a   : > { %v208_v2 = vld [vmem:[%s188_s12 + $0x20] sm:$0xf] (%p47_p5)  ;;  %v210_v3 = vld [vmem:[%s188_s12 + $0x30] sm:$0xf] (%p47_p5)  ;;  %205 = vst [vmem:[%s184_s13] sm:$0xf] (%p47_p5), %v204_v0 }
  0x1b   : > { %v212_v4 = vld [vmem:[%s188_s12 + $0x40] sm:$0xf] (%p47_p5)  ;;  %207 = vst [vmem:[%s184_s13 + $0x4] sm:$0xf] (%p47_p5), %v206_v1  ;;  %209 = vst [vmem:[%s184_s13 + $0x8] sm:$0xf] (%p47_p5), %v208_v2 }
  0x1c   : > { %211 = vst [vmem:[%s184_s13 + $0xc] sm:$0xf] (%p47_p5), %v210_v3  ;;  %213 = vst [vmem:[%s184_s13 + $0x10] sm:$0xf] (%p47_p5), %v212_v4 }
  0x1d PF: > { %p703_p9 = scmp.ge.s32.totalorder %s878_s21, 1  ;;  %p245_p10 = scmp.lt.s32.totalorder %s878_s21, 5 }
  0x1f   : > { %p246_p11 = pnand %p703_p9, %p245_p10 }
  0x20   : > { %s252_s14 = sand.u32 (!%p246_p11), 1, %s854_s15   ;;  %p290_p12 = scmp.lt.s32.totalorder (!%p246_p11), %s866_s18, 1  ;;  %v822_v5 = vld [vmem:[%s1055_s1] sm:$0xff] (!%p246_p11)   ;;  %vm335_vm0 = vcmask (!%p246_p11), 293888   ;;  %vm342_vm1 = vcmask (!%p246_p11), 1041408   ;;  %v823_v10 = vld [vmem:[%s1055_s1 + $0x8] sm:$0xff] (!%p246_p11)  }
  0x21   : > { %249 = sbr.rel (%p246_p11) target bundleno = 440 (0x1b8), region = 65  ;;  %755 = vmatprep.mubr.msk.bf16.mxu0 (!%p246_p11), %vm335_vm0, %v822_v5  ;;  %s704_s13 = sshll.u32 (!%p246_p11), %s252_s14, 4 }
  0x22   : > { %s761_s26 = smul.u32 (!%p246_p11), 20, %s252_s14  ;;  %s992_s24 = scalar_lea.vmem (!%p246_p11), [#allocation5], %s704_s13 }
  0x23   : > { %p720_p13 = scmp.ne.s32.totalorder (!%p246_p11), %s862_s17, 0 }
  0x24   : > { %s254_s30 = scalar_lea.vmem (!%p246_p11), [#allocation4], %s761_s26 }
  0x25   : > { %v819_v6 = vld [vmem:[%s254_s30] sm:$0xff] (!%p246_p11)   ;;  %v820_v7 = vld [vmem:[%s254_s30 + $0x8] sm:$0xff] (!%p246_p11)   ;;  %v821_v8 = vld [vmem:[%s254_s30 + $0x10] ss:$0 sps:$4 sm:$0x33] (!%p246_p11)  }
  0x26   : > { %749 = vmatprep.subr.bf16.mxu0 (!%p246_p11), %v819_v6  ;;  %v344_v9 = vsel (!%p246_p11), %vm342_vm1, %v821_v8, 0 }
  0x27   : > { %750 = vmatpush3.bf16.msra.mxu0 (!%p246_p11), %v819_v6 }
  0x28   : > { %s291_s28 = scalar_select %p290_p12, %s866_s18, 1  ;;  %751 = vmatprep.subr.bf16.mxu0 %v820_v7 }
  0x29   : > { %vm419_vm2 = vcmask (!%p720_p13), 7168   ;;  %v880_v17 = vmov (!%p720_p13), 0.0  }
  0x2a   : > { %s727_s29 = sshll.u32 %s291_s28, 5  ;;  %420 = vst.msk [vmem:[#allocation2] sm:$0xff] (!%p720_p13), %vm419_vm2, %v880_v17  ;;  %421 = vst.msk [vmem:[#allocation2 + $0x8] sm:$0xff] (!%p720_p13), %vm419_vm2, %v880_v17 }
  0x2b   : > { %s981_s8 = scalar_lea.vmem %s1057_s3, %s727_s29  ;;  %s986_s10 = scalar_lea.vmem %s1058_s4, %s727_s29  ;;  %752 = vmatpush3.bf16.msra.mxu0 %v820_v7  ;;  %422 = vst.msk [vmem:[#allocation2 + $0x10] sm:$0xff] (!%p720_p13), %vm419_vm2, %v880_v17  ;;  %423 = vst.msk [vmem:[#allocation2 + $0x18] sm:$0xff] (!%p720_p13), %vm419_vm2, %v880_v17 }
  0x2c   : > { %759 = vmatprep.subr.msk.bf16.mxu0 %vm342_vm1, %v821_v8  ;;  %424 = vst.msk [vmem:[#allocation3] sm:$0xff] (!%p720_p13), %vm419_vm2, %v880_v17  ;;  %425 = vst.msk [vmem:[#allocation3 + $0x8] sm:$0xff] (!%p720_p13), %vm419_vm2, %v880_v17 }
  0x2d   : > { %426 = vst.msk [vmem:[#allocation3 + $0x10] sm:$0xff] (!%p720_p13), %vm419_vm2, %v880_v17  ;;  %427 = vst.msk [vmem:[#allocation3 + $0x18] sm:$0xff] (!%p720_p13), %vm419_vm2, %v880_v17 }
  0x2f   : > { %754 = vmatpush3.bf16.msra.mxu0 %v344_v9 }
  0x32   : > { %756 = vmatmul.mubr.msk.bf16.vlgmr.msra.gmra.mrb[0].mxu0 %vm335_vm0, %v823_v10 }
 0x105   : > { %v757_v11 = vpop.f32.mrb[0].mxu0  ;;  %418 = sbr.rel (%p720_p13) target bundleno = 268 (0x10c), region = 73 }
 0x106   : > { %v380_v12 = vpop.f32.mrb[1].mxu0 }
 0x107   : > { %v758_v13 = vpop.f32.mrb[2].mxu0 }
 0x108   : > { %v741_v14 = vpack.c.bf16 %v758_v13, %v757_v11  ;;  %v383_v15 = vpop.f32.mrb[3].mxu0 }
 0x109   : > { %v736_v16 = vpack.c.bf16 %v383_v15, %v380_v12 }
 0x10a   : > { %743 = vst [vmem:[%s992_s24 + $0x8] sm:$0xff] %v741_v14  }
 0x10b   : > { %737 = vst [vmem:[%s992_s24] sm:$0xff] %v736_v16  }
 0x10c PF: > { %436 = vadd.xlane.f32.xlu1 %v757_v11  ;;  %432 = vadd.xlane.f32.xlu0 %v380_v12  ;;  %v454_v18 = vmul.f32 %v383_v15, %v383_v15  ;;  %v453_v19 = vmul.f32 %v380_v12, %v380_v12  ;;  %v456_v20 = vmul.f32 %v758_v13, %v758_v13  ;;  %v430_v22 = vld [vmem:[#allocation2 + $0x10] sm:$0xff]  ;;  %v428_v23 = vld [vmem:[#allocation2] sm:$0xff]  ;;  %vm444_vm3 = vcmask 7168   ;;  %v431_v28 = vld [vmem:[#allocation2 + $0x18] sm:$0xff]  ;;  %p721_p0 = scmp.ne.s32.totalorder %s862_s17, 1 }
 0x10d   : > { %v455_v21 = vmul.f32 %v757_v11, %v757_v11  ;;  %v429_v29 = vld [vmem:[#allocation2 + $0x8] sm:$0xff]  ;;  %v449_v35 = vld [vmem:[#allocation3] sm:$0xff]  ;;  %v452_v40 = vld [vmem:[#allocation3 + $0x18] sm:$0xff] }
 0x10e   : > { %v450_v34 = vld [vmem:[#allocation3 + $0x8] sm:$0xff]  ;;  %v451_v41 = vld [vmem:[#allocation3 + $0x10] sm:$0xff] }
 0x110   : > { %438 = vadd.xlane.f32.xlu1 %v758_v13  ;;  %434 = vadd.xlane.f32.xlu0 %v383_v15 }
 0x114   : > { %459 = vadd.xlane.f32.xlu1 %v454_v18  ;;  %457 = vadd.xlane.f32.xlu0 %v453_v19 }
 0x118   : > { %463 = vadd.xlane.f32.xlu1 %v456_v20  ;;  %461 = vadd.xlane.f32.xlu0 %v455_v21 }
 0x199   : > { %v437_v24 = vpop.xlane.xlu1 %436  ;;  %v433_v25 = vpop.xlane.xlu0 %432 }
 0x19a   : > { %v442_v26 = vadd.f32 %v437_v24, %v430_v22  ;;  %v440_v27 = vadd.f32 %v433_v25, %v428_v23 }
 0x19c   : > { %447 = vst.msk [vmem:[#allocation2 + $0x10] sm:$0xff] %vm444_vm3, %v442_v26  ;;  %445 = vst.msk [vmem:[#allocation2] sm:$0xff] %vm444_vm3, %v440_v27 }
 0x19d   : > { %v439_v30 = vpop.xlane.xlu1 %438  ;;  %v435_v31 = vpop.xlane.xlu0 %434 }
 0x19e   : > { %v443_v32 = vadd.f32 %v439_v30, %v431_v28  ;;  %v441_v33 = vadd.f32 %v435_v31, %v429_v29 }
 0x1a0   : > { %448 = vst.msk [vmem:[#allocation2 + $0x18] sm:$0xff] %vm444_vm3, %v443_v32  ;;  %446 = vst.msk [vmem:[#allocation2 + $0x8] sm:$0xff] %vm444_vm3, %v441_v33 }
 0x1a1   : > { %v460_v36 = vpop.xlane.xlu1 %459  ;;  %v458_v37 = vpop.xlane.xlu0 %457 }
 0x1a2   : > { %v466_v38 = vadd.f32 %v460_v36, %v450_v34  ;;  %v465_v39 = vadd.f32 %v458_v37, %v449_v35  ;;  %476 = sbr.rel (%p721_p0) target bundleno = 433 (0x1b1), region = 77 }
 0x1a3   : > { %v477_v46 = vld [vmem:[#allocation2] sm:$0xff] (!%p721_p0)  ;;  %v479_v48 = vld [vmem:[#allocation2 + $0x10] sm:$0xff] (!%p721_p0) }
 0x1a4   : > { %470 = vst.msk [vmem:[#allocation3 + $0x8] sm:$0xff] %vm444_vm3, %v466_v38  ;;  %469 = vst.msk [vmem:[#allocation3] sm:$0xff] %vm444_vm3, %v465_v39 }
 0x1a5   : > { %v464_v42 = vpop.xlane.xlu1 %463  ;;  %v462_v43 = vpop.xlane.xlu0 %461  ;;  %481 = vst.msk [vmem:[%s981_s8] sm:$0xff] (!%p721_p0), %vm444_vm3, %v477_v46  ;;  %483 = vst.msk [vmem:[%s981_s8 + $0x10] sm:$0xff] (!%p721_p0), %vm444_vm3, %v479_v48 }
 0x1a6   : > { %v468_v44 = vadd.f32 %v464_v42, %v452_v40  ;;  %v467_v45 = vadd.f32 %v462_v43, %v451_v41 }
 0x1a7   : > { %v478_v47 = vld [vmem:[#allocation2 + $0x8] sm:$0xff] (!%p721_p0)  ;;  %v480_v49 = vld [vmem:[#allocation2 + $0x18] sm:$0xff] (!%p721_p0) }
 0x1a8   : > { %472 = vst.msk [vmem:[#allocation3 + $0x18] sm:$0xff] %vm444_vm3, %v468_v44  ;;  %471 = vst.msk [vmem:[#allocation3 + $0x10] sm:$0xff] %vm444_vm3, %v467_v45 }
 0x1a9   : > { %482 = vst.msk [vmem:[%s981_s8 + $0x8] sm:$0xff] %vm444_vm3, %v478_v47  ;;  %484 = vst.msk [vmem:[%s981_s8 + $0x18] sm:$0xff] %vm444_vm3, %v480_v49 }
 0x1ab   : > { %v485_v50 = vld [vmem:[#allocation3] sm:$0xff]  ;;  %v486_v51 = vld [vmem:[#allocation3 + $0x8] sm:$0xff] }
 0x1ac   : > { %489 = vst.msk [vmem:[%s986_s10] sm:$0xff] %vm444_vm3, %v485_v50  ;;  %490 = vst.msk [vmem:[%s986_s10 + $0x8] sm:$0xff] %vm444_vm3, %v486_v51 }
 0x1af   : > { %v487_v52 = vld [vmem:[#allocation3 + $0x10] sm:$0xff]  ;;  %v488_v53 = vld [vmem:[#allocation3 + $0x18] sm:$0xff] }
 0x1b0   : > { %491 = vst.msk [vmem:[%s986_s10 + $0x10] sm:$0xff] %vm444_vm3, %v487_v52  ;;  %492 = vst.msk [vmem:[%s986_s10 + $0x18] sm:$0xff] %vm444_vm3, %v488_v53 }
 0x1b1 PF: > { %509 = sbr.rel (!%p954_p6) target bundleno = 440 (0x1b8), region = 81  ;;  %s723_s14 = sshll.u32 (%p954_p6), %s866_s18, 1  ;;  %v529_v54 = vld [vmem:[%s992_s24] sm:$0xf] (%p954_p6)  ;;  %v531_v55 = vld [vmem:[%s992_s24 + $0x4] sm:$0xf] (%p954_p6) }
 0x1b2   : > { %s511_s25 = sadd.s32 (%p954_p6), %s862_s17, %s723_s14  ;;  %v533_v56 = vld [vmem:[%s992_s24 + $0x8] sm:$0xf] (%p954_p6)  ;;  %v535_v57 = vld [vmem:[%s992_s24 + $0xc] sm:$0xf] (%p954_p6) }
 0x1b3   : > { %s724_s26 = sshll.u32 (%p954_p6), %s511_s25, 2 }
 0x1b4   : > { %s513_s30 = scalar_lea.vmem (%p954_p6), %s1056_s2, %s724_s26 }
 0x1b5   : > { %530 = vst [vmem:[%s513_s30] sm:$0xf] (%p954_p6), %v529_v54  ;;  %532 = vst [vmem:[%s513_s30 + $0x10] sm:$0xf] (%p954_p6), %v531_v55 }
 0x1b6   : > { %534 = vst [vmem:[%s513_s30 + $0x20] sm:$0xf] (%p954_p6), %v533_v56  ;;  %536 = vst [vmem:[%s513_s30 + $0x30] sm:$0xf] (%p954_p6), %v535_v57 }
 0x1b8 PF: > { %s15_s21 = sadd.s32 1, %s878_s21   ;;  %s1060_s15 = smov %s858_s16 }
 0x1b9   : > { %p12_p1 = scmp.ge.s32.totalorder %s15_s21, 6   ;;  %s1061_s16 = smov %s962_s6 }
 0x1ba   : > { %s1062_s17 = smov %s870_s19  ;;  %s1063_s18 = smov %s874_s20 }
 0x1bb   : > { %s1064_s19 = smov %s1067_s22  ;;  %s1065_s20 = smov %s1071_s23 }
 0x1bc   :  { %14 = sbr.rel (!%p12_p1) target bundleno = 4 (0x4), region = 177 }

</bundles_post_ra>
